<compile_context>
chip_gen: v6e
topology: v6e:2x2x1
jax: 0.10.0
libtpu: 0.0.40
codegen_flags: <defaults>
</compile_context>

<pallas_src>
import math

import jax
import jax.numpy as jnp
from jax.experimental import pallas as pl
from jax.experimental.pallas import tpu as pltpu


def _round_up(x, m):
    return ((x + m - 1) // m) * m


def _pick_lane_tile(d, cap):
    """Largest tile <= cap that divides d (d is a multiple of 128)."""
    if d <= cap:
        return d
    for t in (cap, 512, 384, 256, 128):
        if t <= cap and d % t == 0:
            return t
    return 128  # 128 always divides d


# ----------------------------------------------------------------------------
# Pass 1: support = x2d @ weight     (x2d = [M_pad, Fin_pad])
# ----------------------------------------------------------------------------
def _support_kernel(x_ref, w_ref, o_ref):
    # Fast path: x_ref (TM, Fin_pad), w_ref (Fin_pad, Fout_pad) resident
    # (constant index_map), o_ref (TM, Fout_pad) lane-dense.
    o_ref[...] = jnp.dot(
        x_ref[...], w_ref[...], preferred_element_type=jnp.float32
    ).astype(o_ref.dtype)


def _support_tiled_kernel(x_ref, w_ref, o_ref, acc_ref):
    # Tiled path for large Fin/Fout: grid (i, j, k), f32 accumulator over k.
    k = pl.program_id(2)

    @pl.when(k == 0)
    def _():
        acc_ref[...] = jnp.zeros_like(acc_ref)

    acc_ref[...] += jnp.dot(
        x_ref[...], w_ref[...], preferred_element_type=jnp.float32
    )

    @pl.when(k == pl.num_programs(2) - 1)
    def _():
        o_ref[...] = acc_ref[...].astype(o_ref.dtype)


# ----------------------------------------------------------------------------
# Pass 2: output[b] = adj[b] @ support[b]  (+ bias), tiled over (b, i, k)
# ----------------------------------------------------------------------------
def _aggregate_kernel(adj_ref, s_ref, o_ref, acc_ref):
    k = pl.program_id(2)

    @pl.when(k == 0)
    def _():
        acc_ref[...] = jnp.zeros_like(acc_ref)

    acc_ref[...] += jnp.dot(
        adj_ref[...], s_ref[...], preferred_element_type=jnp.float32
    )

    @pl.when(k == pl.num_programs(2) - 1)
    def _():
        o_ref[...] = acc_ref[...].astype(o_ref.dtype)


def _aggregate_bias_kernel(adj_ref, s_ref, b_ref, o_ref, acc_ref):
    k = pl.program_id(2)

    @pl.when(k == 0)
    def _():
        acc_ref[...] = jnp.zeros_like(acc_ref)

    acc_ref[...] += jnp.dot(
        adj_ref[...], s_ref[...], preferred_element_type=jnp.float32
    )

    @pl.when(k == pl.num_programs(2) - 1)
    def _():
        # Bias add in f32; single cast at the store (v5e-friendly: no bf16 VPU work).
        o_ref[...] = (acc_ref[...] + b_ref[...]).astype(o_ref.dtype)


# ----------------------------------------------------------------------------
# Wrapper
# ----------------------------------------------------------------------------
def graph_convolution(x, adj, weight, bias=None, *, compute_dtype=jnp.bfloat16):
    """Pallas GCN layer: (adj @ (x @ weight)) [+ bias].

    x: [B, N, Fin], adj: [B, N, N], weight: [Fin, Fout], bias: [1, 1, Fout] or None.
    """
    B, N, Fin = x.shape
    Fin_w, Fout = weight.shape
    assert Fin_w == Fin
    assert adj.shape == (B, N, N)
    if bias is not None:
        assert bias.shape == (1, 1, Fout)

    out_dtype = x.dtype
    cd = jnp.dtype(compute_dtype)
    VMEM_LIMIT = 32 * 1024 * 1024  # stay inside v7x's scoped default / 64 MiB physical

    # ---- padding / tiling decisions -------------------------------------
    LANE = 128
    fin_p = _round_up(Fin, LANE)    # lane dim of x / sublane dim of weight
    fout_p = _round_up(Fout, LANE)  # lane-dense support / output stores

    if N < 256:
        n_p = _round_up(N, 8)       # tiny graphs: one full-extent tile
        tn = n_p
    else:
        # Pick the adj tile (256 vs 128) that minimises padded adj traffic;
        # adj is the dominant HBM stream, so padding waste there is what hurts.
        n256, n128 = _round_up(N, 256), _round_up(N, 128)
        n_p, tn = (n128, 128) if n128 < n256 else (n256, 256)
    tk = tn

    # ---- pad + cast (zero padding keeps the math exact; padded rows/cols
    #      contribute nothing and are sliced off at the end) ----------------
    xp = jnp.pad(x, ((0, 0), (0, n_p - N), (0, fin_p - Fin))).astype(cd)
    ap = jnp.pad(adj, ((0, 0), (0, n_p - N), (0, n_p - N))).astype(cd)
    wp = jnp.pad(weight, ((0, fin_p - Fin), (0, fout_p - Fout))).astype(cd)

    # ---- pass 1: support = (M_pad, Fin_pad) @ (Fin_pad, Fout_pad) ---------
    m = B * n_p                      # multiple of 8 (n_p is)
    tm = 256 if m >= 256 else m
    m_p = _round_up(m, tm)
    x2d = xp.reshape(m, fin_p)
    if m_p != m:
        x2d = jnp.pad(x2d, ((0, m_p - m), (0, 0)))

    tfi = _pick_lane_tile(fin_p, 512)    # reduction tile over Fin
    tfo = _pick_lane_tile(fout_p, 1024)  # output-column tile over Fout

    if tfi == fin_p and tfo == fout_p:
        # Fast path: whole weight resident in VMEM, no reduction axis, no scratch.
        support2d = pl.pallas_call(
            _support_kernel,
            out_shape=jax.ShapeDtypeStruct((m_p, fout_p), cd),
            grid_spec=pltpu.PrefetchScalarGridSpec(
                num_scalar_prefetch=0,
                grid=(m_p // tm,),
                in_specs=[
                    pl.BlockSpec((tm, fin_p), lambda i: (i, 0)),
                    pl.BlockSpec((fin_p, fout_p), lambda i: (0, 0)),  # resident weight
                ],
                out_specs=pl.BlockSpec((tm, fout_p), lambda i: (i, 0)),
            ),
            compiler_params=pltpu.CompilerParams(
                dimension_semantics=("parallel",),
                vmem_limit_bytes=VMEM_LIMIT,
            ),
            cost_estimate=pl.CostEstimate(
                flops=2 * m_p * fin_p * fout_p,
                transcendentals=0,
                bytes_accessed=(m_p * fin_p + fin_p * fout_p + m_p * fout_p)
                * cd.itemsize,
            ),
        )(x2d, wp)
    else:
        # Tiled path: large Fin and/or Fout, f32 accumulator over the Fin axis.
        support2d = pl.pallas_call(
            _support_tiled_kernel,
            out_shape=jax.ShapeDtypeStruct((m_p, fout_p), cd),
            grid_spec=pltpu.PrefetchScalarGridSpec(
                num_scalar_prefetch=0,
                grid=(m_p // tm, fout_p // tfo, fin_p // tfi),
                in_specs=[
                    pl.BlockSpec((tm, tfi), lambda i, j, k: (i, k)),
                    pl.BlockSpec((tfi, tfo), lambda i, j, k: (k, j)),
                ],
                out_specs=pl.BlockSpec((tm, tfo), lambda i, j, k: (i, j)),
                scratch_shapes=[pltpu.VMEM((tm, tfo), jnp.float32)],
            ),
            compiler_params=pltpu.CompilerParams(
                dimension_semantics=("parallel", "parallel", "arbitrary"),
                vmem_limit_bytes=VMEM_LIMIT,
            ),
            cost_estimate=pl.CostEstimate(
                flops=2 * m_p * fin_p * fout_p,
                transcendentals=0,
                bytes_accessed=(
                    m_p * fin_p * (fout_p // tfo)
                    + fin_p * fout_p * (m_p // tm)
                    + m_p * fout_p
                )
                * cd.itemsize,
            ),
        )(x2d, wp)

    support = support2d[:m].reshape(B, n_p, fout_p)

    # ---- pass 2: output = adj @ support (+ bias) --------------------------
    # TODO(synk): tile Fout in pass 2 as well for extremely large output widths
    # (current blocks carry the full padded Fout; fine for typical GCN sizes).
    grid = (B, n_p // tn, n_p // tk)
    adj_spec = pl.BlockSpec((pl.Squeezed(), tn, tk), lambda b, i, k: (b, i, k))
    sup_spec = pl.BlockSpec((pl.Squeezed(), tk, fout_p), lambda b, i, k: (b, k, 0))
    out_spec = pl.BlockSpec((pl.Squeezed(), tn, fout_p), lambda b, i, k: (b, i, 0))

    common = dict(
        out_shape=jax.ShapeDtypeStruct((B, n_p, fout_p), out_dtype),
        compiler_params=pltpu.CompilerParams(
            dimension_semantics=("parallel", "parallel", "arbitrary"),
            vmem_limit_bytes=VMEM_LIMIT,
        ),
        cost_estimate=pl.CostEstimate(
            flops=2 * B * n_p * n_p * fout_p,
            transcendentals=0,
            bytes_accessed=(
                B * n_p * n_p * cd.itemsize                         # adj (dominant)
                + B * n_p * fout_p * cd.itemsize * (n_p // tn)      # support re-reads
                + B * n_p * fout_p * jnp.dtype(out_dtype).itemsize  # output
            ),
        ),
    )
    scratch = [pltpu.VMEM((tn, fout_p), jnp.float32)]  # f32 accumulator

    if bias is None:
        # Specialized no-bias variant: no zero-bias DMA / VPU add per step.
        out = pl.pallas_call(
            _aggregate_kernel,
            grid_spec=pltpu.PrefetchScalarGridSpec(
                num_scalar_prefetch=0,
                grid=grid,
                in_specs=[adj_spec, sup_spec],
                out_specs=out_spec,
                scratch_shapes=scratch,
            ),
            **common,
        )(ap, support)
    else:
        bp = jnp.pad(
            bias.reshape(1, Fout).astype(jnp.float32), ((0, 0), (0, fout_p - Fout))
        )
        bias_spec = pl.BlockSpec((1, fout_p), lambda b, i, k: (0, 0))  # resident
        out = pl.pallas_call(
            _aggregate_bias_kernel,
            grid_spec=pltpu.PrefetchScalarGridSpec(
                num_scalar_prefetch=0,
                grid=grid,
                in_specs=[adj_spec, sup_spec, bias_spec],
                out_specs=out_spec,
                scratch_shapes=scratch,
            ),
            **common,
        )(ap, support, bp)

    return out[:, :N, :Fout]


# ----------------------------------------------------------------------------
# Parameter init matching reset_parameters(): U(-stdv, stdv), stdv = 1/sqrt(Fout)
# ----------------------------------------------------------------------------
def init_params(key, in_features, out_features, use_bias):
    stdv = 1.0 / math.sqrt(out_features)
    kw, kb = jax.random.split(key)
    weight = jax.random.uniform(
        kw, (in_features, out_features), dtype=jnp.float32, minval=-stdv, maxval=stdv
    )
    bias = None
    if use_bias:
        bias = jax.random.uniform(
            kb, (1, 1, out_features), dtype=jnp.float32, minval=-stdv, maxval=stdv
        )
    return weight, bias


def _reference(x, adj, weight, bias, compute_dtype):
    """Pure-JAX reference replicating the kernel's bf16 rounding points."""
    f32 = jnp.float32
    xc = x.astype(compute_dtype).astype(f32)
    ac = adj.astype(compute_dtype).astype(f32)
    wc = weight.astype(compute_dtype).astype(f32)
    support = jnp.matmul(xc, wc)
    support = support.astype(compute_dtype).astype(f32)  # support stored in compute dtype
    out = jnp.matmul(ac, support)
    if bias is not None:
        out = out + bias.astype(f32)
    return out.astype(x.dtype)


if __name__ == "__main__":
    key = jax.random.PRNGKey(0)

    # --- small case matching the module's typical use (bias=False default) ---
    B, N, F_IN, F_OUT = 2, 16, 32, 32
    k_x, k_adj, k_param, k2, k3 = jax.random.split(key, 5)

    x = jax.random.normal(k_x, (B, N, F_IN), dtype=jnp.float32)
    adj = jax.random.uniform(k_adj, (B, N, N), dtype=jnp.float32)
    weight, bias = init_params(k_param, F_IN, F_OUT, use_bias=True)

    out_nb = jax.block_until_ready(graph_convolution(x, adj, weight, bias=None))
    out_b = jax.block_until_ready(graph_convolution(x, adj, weight, bias=bias))

    ref_nb = _reference(x, adj, weight, None, jnp.bfloat16)
    ref_b = _reference(x, adj, weight, bias, jnp.bfloat16)

    assert out_nb.shape == (B, N, F_OUT) and out_b.shape == (B, N, F_OUT)
    assert jnp.allclose(out_nb, ref_nb, atol=2e-3, rtol=2e-3)
    assert jnp.allclose(out_b, ref_b, atol=2e-3, rtol=2e-3)

    # --- medium case exercising the tiled (N >= 256) reduction path ---------
    B2, N2, F_IN2, F_OUT2 = 1, 512, 64, 96
    kx2, ka2, kp2 = jax.random.split(k2, 3)
    x2 = jax.random.normal(kx2, (B2, N2, F_IN2), dtype=jnp.float32)
    adj2 = jax.random.uniform(ka2, (B2, N2, N2), dtype=jnp.float32)
    w2, b2 = init_params(kp2, F_IN2, F_OUT2, use_bias=True)

    out2 = jax.block_until_ready(graph_convolution(x2, adj2, w2, bias=b2))
    ref2 = _reference(x2, adj2, w2, b2, jnp.bfloat16)
    assert out2.shape == (B2, N2, F_OUT2)
    assert jnp.allclose(out2, ref2, atol=2e-2, rtol=2e-3)

    # --- case exercising the Fin-tiled support GEMM (Fin > 512) -------------
    B3, N3, F_IN3, F_OUT3 = 2, 64, 640, 48
    kx3, ka3, kp3 = jax.random.split(k3, 3)
    x3 = jax.random.normal(kx3, (B3, N3, F_IN3), dtype=jnp.float32)
    adj3 = jax.random.uniform(ka3, (B3, N3, N3), dtype=jnp.float32)
    w3, _ = init_params(kp3, F_IN3, F_OUT3, use_bias=False)

    out3 = jax.block_until_ready(graph_convolution(x3, adj3, w3, bias=None))
    ref3 = _reference(x3, adj3, w3, None, jnp.bfloat16)
    assert out3.shape == (B3, N3, F_OUT3)
    assert jnp.allclose(out3, ref3, atol=5e-2, rtol=5e-3)

    print("KERNEL_OK")
</pallas_src>

<mosaic_0001>
module attributes {stable_mosaic.version = 11 : i64} {
  func.func @_support_kernel(%arg0: i32, %arg1: memref<32x128xbf16, #tpu.memory_space<vmem>>, %arg2: memref<128x128xbf16, #tpu.memory_space<vmem>>, %arg3: memref<32x128xbf16, #tpu.memory_space<vmem>>) attributes {dimension_semantics = [#tpu.dimension_semantics<parallel>], iteration_bounds = array<i64: 1>, scalar_prefetch = 0 : i64, scratch_operands = 0 : i64, tpu.core_type = #tpu.core_type<tc>, window_params = [{transform_indices = @transform_0, window_bounds = array<i64: 32, 128>}, {pipeline_mode = #tpu.pipeline_mode<synchronous>, transform_indices = @transform_1, window_bounds = array<i64: 128, 128>}, {transform_indices = @transform_2, window_bounds = array<i64: 32, 128>}]} {
    %c0 = arith.constant 0 : index
    %c0_0 = arith.constant 0 : index
    %0 = vector.load %arg1[%c0, %c0_0] : memref<32x128xbf16, #tpu.memory_space<vmem>>, vector<32x128xbf16>
    %c0_1 = arith.constant 0 : index
    %c0_2 = arith.constant 0 : index
    %1 = vector.load %arg2[%c0_1, %c0_2] : memref<128x128xbf16, #tpu.memory_space<vmem>>, vector<128x128xbf16>
    %cst = arith.constant dense<0.000000e+00> : vector<32x128xf32>
    %2 = tpu.matmul %0, %1, %cst {dimension_numbers = #tpu.dot_dimension_numbers<[1], [0], [0], [1], [0, 0, 1, 1], [], []>} : vector<32x128xbf16>, vector<128x128xbf16>, vector<32x128xf32> -> vector<32x128xf32>
    %3 = arith.truncf %2 : vector<32x128xf32> to vector<32x128xbf16>
    %c0_3 = arith.constant 0 : index
    %c0_4 = arith.constant 0 : index
    %4 = vector.load %arg3[%c0_3, %c0_4] : memref<32x128xbf16, #tpu.memory_space<vmem>>, vector<32x128xbf16>
    tpu.vector_store %arg3[%c0_3, %c0_4], %3 {strides = array<i32>} : memref<32x128xbf16, #tpu.memory_space<vmem>>, vector<32x128xbf16>,
    return
  }
  func.func @transform_0(%arg0: i32) -> (i32, i32) {
    %c0_i32 = arith.constant 0 : i32
    %c0_i32_0 = arith.constant 0 : i32
    return %arg0, %c0_i32 : i32, i32
  }
  func.func @transform_1(%arg0: i32) -> (i32, i32) {
    %c0_i32 = arith.constant 0 : i32
    %c0_i32_0 = arith.constant 0 : i32
    %c0_i32_1 = arith.constant 0 : i32
    return %c0_i32, %c0_i32_0 : i32, i32
  }
  func.func @transform_2(%arg0: i32) -> (i32, i32) {
    %c0_i32 = arith.constant 0 : i32
    %c0_i32_0 = arith.constant 0 : i32
    return %arg0, %c0_i32 : i32, i32
  }
}

</mosaic_0001>

<bundles_post_ra>
// kernel: tpu_custom_call.1
= control target key start
LH: loop header
LB: loop body
LE: loop exit
PB: predicated region body
PF: predicated region fallthrough
CT: control target
= control target key end

     0   :  { %7 = vsyncpa [#allocation3], 0  ;;  %s386_s0 = inlined_call_operand.hbm [shape: bf16[32,128], index: 0, kind: input, shape index: {}]   ;;  %s387_s1 = inlined_call_operand.hbm [shape: bf16[128,128], index: 1, kind: input, shape index: {}]   ;;  %s388_s2 = inlined_call_operand.hbm [shape: bf16[32,128], index: 2, kind: output, shape index: {}]  }
   0x1   :  { %8 = vsyncpa [#allocation6], 0 }
   0x2   :  { %9 = vsyncpa [#allocation4], 0  ;;  %s348_s9 = smov [#allocation2]  }
   0x3   :  { %s15_s10 = sshll.u32 %s348_s9, 4  ;;  %s16_s10 = int_to_ptr.vmem [resolvable:$true] %s15_s10 }
   0x4   :  { %s290_s11 = scalar_lea.vmem %s16_s10, 256  ;;  %p295_p1 = scmp.lt.s32.totalorder %s16_s10, %s16_s10 }
   0x5   :  { %p291_p0 = scmp.ne.s32.totalorder %s16_s10, %s290_s11  ;;  %p296_p2 = scmp.lt.s32.totalorder %s290_s11, %s290_s11 }
   0x7   :  { %p297_p3 = por %p296_p2, %p295_p1 }
   0x9   :  { %p298_p4 = pnand %p297_p3, %p291_p0 }
   0xb   :  { %301 = shalt.err (!%p298_p4)
}
   0xc   :  { %s349_s12 = smov 64   ;;  %s350_s13 = smov 4  }
   0xd   :  { %21 = dma.hbm_to_vmem [thread:$0]  %s386_s0, 256, %s16_s10, [#allocation3], %s349_s12, %s349_s12, %s350_s13  }
   0xe   :  { %s351_s16 = smov [#allocation5]  }
   0xf   :  { %s27_s17 = sshll.u32 %s351_s16, 4  ;;  %s28_s17 = int_to_ptr.vmem [resolvable:$true] %s27_s17 }
  0x10   :  { %s310_s18 = scalar_lea.vmem %s28_s17, 1024  ;;  %p315_p6 = scmp.lt.s32.totalorder %s28_s17, %s28_s17 }
  0x11   :  { %p311_p5 = scmp.ne.s32.totalorder %s28_s17, %s310_s18  ;;  %p316_p7 = scmp.lt.s32.totalorder %s310_s18, %s310_s18 }
  0x13   :  { %p317_p8 = por %p316_p7, %p315_p6 }
  0x15   :  { %p318_p9 = pnand %p317_p8, %p311_p5 }
  0x17   :  { %321 = shalt.err (!%p318_p9)
}
  0x18   :  { %33 = dma.hbm_to_vmem [thread:$0]  %s387_s1, 1024, %s28_s17, [#allocation6], %s349_s12, %s349_s12, %s350_s13  }
  0x19   :  { %342 = dma.done.wait [#allocation3], 256  }
  0x1a   :  { %343 = vsyncadd [#allocation3], 4294967040 }
  0x1b   :  { %344 = dma.done.wait [#allocation6], 1024  }
  0x1c   :  { %345 = vsyncadd [#allocation6], 4294966272  ;;  %v272_v0 = vld [vmem:[#allocation5 + $0x38] sm:$0xff]   ;;  %v273_v1 = vld [vmem:[#allocation5 + $0x30] sm:$0xff]   ;;  %s352_s0 = smov [#allocation7]  }
  0x1d   :  { %247 = vmatprep.subr.bf16.mxu0 %v272_v0  ;;  %v274_v2 = vld [vmem:[#allocation5 + $0x28] sm:$0xff]   ;;  %v275_v3 = vld [vmem:[#allocation5 + $0x20] sm:$0xff]   ;;  %v280_v4 = vld [vmem:[#allocation2] sm:$0xff]   ;;  %s195_s1 = sshll.u32 %s352_s0, 4  ;;  %s196_s1 = int_to_ptr.vmem [resolvable:$true] %s195_s1 }
  0x1e   :  { %248 = vmatpush3.bf16.msra.mxu0 %v272_v0  ;;  %263 = vmatprep.mubr.bf16.mxu0 %v280_v4  ;;  %v276_v5 = vld [vmem:[#allocation5 + $0x18] sm:$0xff]   ;;  %v277_v6 = vld [vmem:[#allocation5 + $0x10] sm:$0xff]   ;;  %v278_v7 = vld [vmem:[#allocation5 + $0x8] sm:$0xff]   ;;  %s322_s21 = scalar_lea.vmem %s196_s1, 256  ;;  %p327_p11 = scmp.lt.s32.totalorder %s196_s1, %s196_s1 }
  0x1f   :  { %249 = vmatprep.subr.bf16.mxu0 %v273_v1  ;;  %v279_v8 = vld [vmem:[#allocation5] sm:$0xff]   ;;  %v281_v9 = vld [vmem:[#allocation2 + $0x8] sm:$0xff]   ;;  %p323_p10 = scmp.ne.s32.totalorder %s196_s1, %s322_s21  ;;  %p328_p12 = scmp.lt.s32.totalorder %s322_s21, %s322_s21 }
  0x21   :  { %p329_p13 = por %p328_p12, %p327_p11 }
  0x22   :  { %250 = vmatpush3.bf16.msra.mxu0 %v273_v1 }
  0x23   :  { %251 = vmatprep.subr.bf16.mxu0 %v274_v2  ;;  %p330_p0 = pnand %p329_p13, %p323_p10 }
  0x26   :  { %252 = vmatpush3.bf16.msra.mxu0 %v274_v2 }
  0x27   :  { %253 = vmatprep.subr.bf16.mxu0 %v275_v3 }
  0x2a   :  { %254 = vmatpush3.bf16.msra.mxu0 %v275_v3 }
  0x2b   :  { %255 = vmatprep.subr.bf16.mxu0 %v276_v5 }
  0x2e   :  { %256 = vmatpush3.bf16.msra.mxu0 %v276_v5 }
  0x2f   :  { %257 = vmatprep.subr.bf16.mxu0 %v277_v6 }
  0x32   :  { %258 = vmatpush3.bf16.msra.mxu0 %v277_v6 }
  0x33   :  { %259 = vmatprep.subr.bf16.mxu0 %v278_v7 }
  0x36   :  { %260 = vmatpush3.bf16.msra.mxu0 %v278_v7 }
  0x37   :  { %261 = vmatprep.subr.bf16.mxu0 %v279_v8 }
  0x3a   :  { %262 = vmatpush3.bf16.msra.mxu0 %v279_v8 }
  0x3d   :  { %264 = vmatmul.mubr.bf16.vlgmr.msra.gmra.mxu0 %v281_v9 }
  0xfd   :  { %v265_v10 = vpop.f32.mrf.mxu0 }
  0xff   :  { %v155_v11 = vpop.f32.mrf.mxu0 }
 0x101   :  { %v266_v12 = vpop.f32.mrf.mxu0 }
 0x102   :  { %v234_v13 = vpack.c.bf16 %v266_v12, %v265_v10 }
 0x103   :  { %v158_v14 = vpop.f32.mrf.mxu0 }
 0x104   :  { %236 = vst [vmem:[#allocation7 + $0x8] sm:$0xff] %v234_v13   ;;  %v229_v15 = vpack.c.bf16 %v158_v14, %v155_v11 }
 0x106   :  { %230 = vst [vmem:[#allocation7] sm:$0xff] %v229_v15  }
 0x107   :  { %333 = shalt.err (!%p330_p0)
}
 0x108   :  { %201 = dma.vmem_to_hbm [thread:$0]  %s196_s1, 256, %s388_s2, [#allocation4], %s349_s12, %s349_s12, %s350_s13  }
 0x109   :  { %346 = dma.done.wait [#allocation4], 256  }
 0x10a   :  { %347 = vsyncadd [#allocation4], 4294967040 }
 0x10b   :  { %205 = vsyncpa [#allocation3], 1 }
 0x10c   :  { %206 = vsyncpa [#allocation6], 1 }
 0x10d   :  { %207 = vsyncpa [#allocation4], 1 }

</bundles_post_ra>
